<compile_context>
chip_gen: v7x
topology: tpu7x:2x2x1
jax: 0.10.0
libtpu: 0.0.40
codegen_flags: <defaults>
</compile_context>

<pallas_src>
import functools

import jax
import jax.numpy as jnp
import numpy as np
from jax.experimental import pallas as pl
from jax.experimental.pallas import tpu as pltpu


# ------------------------- host-side weight folding -------------------------

def _build_fused_params(up_w, up_b, c1_w, c1_b, c2_w, c2_b, H1, W1):
    """Fold PyTorch-layout weights into banded matmul operands (one-time)."""
    up_w = np.asarray(up_w, np.float32)   # (Cin, Chalf, 2, 2)  I,O,kh,kw
    up_b = np.asarray(up_b, np.float32)
    c1_w = np.asarray(c1_w, np.float32)   # (Cmid, Ccat, 3, 3)  OIHW
    c1_b = np.asarray(c1_b, np.float32)
    c2_w = np.asarray(c2_w, np.float32)   # (Cout, Cmid, 3, 3)  OIHW
    c2_b = np.asarray(c2_b, np.float32)

    Cin, Chalf = up_w.shape[0], up_w.shape[1]
    Cmid, Ccat = c1_w.shape[0], c1_w.shape[1]
    Cout = c2_w.shape[0]
    H2, W2 = 2 * H1, 2 * W1
    assert Ccat == Cin == 2 * Chalf and c2_w.shape[1] == Cmid

    # ConvTranspose2d(k=2, s=2): width interleave folded into the columns.
    #   wup[a, j*Cin + ci, (2j+b)*Chalf + co] = up_w[ci, co, a, b]
    wup = np.zeros((2, W1 * Cin, W2 * Chalf), np.float32)
    for a in range(2):
        for b in range(2):
            for j in range(W1):
                wup[a, j * Cin:(j + 1) * Cin,
                    (2 * j + b) * Chalf:(2 * j + b + 1) * Chalf] = up_w[:, :, a, b]
    bup = np.tile(up_b, W2)[None, :]                      # (1, W2*Chalf)

    # Conv1 (Ccat -> Cmid): block-banded matrix per kh over flattened padded
    # rows.  Row layout: [up block (W2+2)*Chalf | skip block (W2+2)*Chalf].
    off = (W2 + 2) * Chalf
    bw1 = np.zeros((3, (W2 + 2) * Ccat, W2 * Cmid), np.float32)
    for kh in range(3):
        for kw in range(3):
            for s in range(W2):
                si = s + kw                               # padded input column
                cols = slice(s * Cmid, (s + 1) * Cmid)
                bw1[kh, si * Chalf:(si + 1) * Chalf, cols] += c1_w[:, :Chalf, kh, kw].T
                bw1[kh, off + si * Chalf:off + (si + 1) * Chalf, cols] += \
                    c1_w[:, Chalf:, kh, kw].T
    b1 = np.tile(c1_b, W2)[None, :]                       # (1, W2*Cmid)

    # Conv2 (Cmid -> Cout)
    bw2 = np.zeros((3, (W2 + 2) * Cmid, W2 * Cout), np.float32)
    for kh in range(3):
        for kw in range(3):
            for s in range(W2):
                si = s + kw
                bw2[kh, si * Cmid:(si + 1) * Cmid,
                    s * Cout:(s + 1) * Cout] += c2_w[:, :, kh, kw].T
    b2 = np.tile(c2_b, W2)[None, :]                       # (1, W2*Cout)

    return {
        "wup": jnp.asarray(wup), "bup": jnp.asarray(bup),
        "bw1": jnp.asarray(bw1), "b1": jnp.asarray(b1),
        "bw2": jnp.asarray(bw2), "b2": jnp.asarray(b2),
        "dims": (Cin, Chalf, Cmid, Cout, H1, W1, H2, W2),
    }


# --------------------------------- kernel -----------------------------------

def _fused_kernel(H1, W1, H2, W2, Chalf, Cmid, Cout,
                  x1_ref, x2_ref, wup_ref, bup_ref, bw1_ref, b1_ref,
                  bw2_ref, b2_ref, o_ref, pin_scr, hp_scr):
    f32 = jnp.float32

    # Zero the padded VMEM scratches: their borders ARE the conv zero-padding
    # (no jnp.pad round trip through HBM).
    pin_scr[...] = jnp.zeros(pin_scr.shape, f32)
    hp_scr[...] = jnp.zeros(hp_scr.shape, f32)

    # ---- ConvTranspose2d(k=2, s=2): two matmuls (one per output-row parity).
    #      Width interleave lives in wup; height interleave = even/odd row
    #      stores straight into the padded concat scratch.                 ----
    x1r = x1_ref[0]                                        # (H1, W1*Cin)
    for a in range(2):
        r_a = jnp.dot(x1r, wup_ref[a], preferred_element_type=f32) + bup_ref[...]
        for i in range(H1):                                # (H1, W2*Chalf)
            row = 1 + 2 * i + a
            pin_scr[row:row + 1, Chalf:Chalf + W2 * Chalf] = r_a[i:i + 1]

    # ---- channel concat with the skip connection (second row block) ----
    off = (W2 + 2) * Chalf
    pin_scr[1:1 + H2, off + Chalf:off + Chalf + W2 * Chalf] = x2_ref[0]

    # ---- DoubleConv layer 1: 3 banded matmuls (one per kh) + bias + ReLU ----
    acc1 = jnp.zeros((H2, W2 * Cmid), f32)
    for kh in range(3):
        acc1 = acc1 + jnp.dot(pin_scr[kh:kh + H2, :], bw1_ref[kh],
                              preferred_element_type=f32)
    h = jnp.maximum(acc1 + b1_ref[...], 0.0)               # (H2, W2*Cmid)

    # h stays in VMEM: re-pad it for layer 2.
    hp_scr[1:1 + H2, Cmid:Cmid + W2 * Cmid] = h

    # ---- DoubleConv layer 2 ----
    acc2 = jnp.zeros((H2, W2 * Cout), f32)
    for kh in range(3):
        acc2 = acc2 + jnp.dot(hp_scr[kh:kh + H2, :], bw2_ref[kh],
                              preferred_element_type=f32)
    o_ref[0] = jnp.maximum(acc2 + b2_ref[...], 0.0)        # (H2, W2*Cout)


# --------------------------------- wrapper ----------------------------------

def upsample_forward(x1_nchw, x2_nchw, fused):
    """UpSample.forward.  Inputs/outputs are NCHW (PyTorch convention)."""
    Cin, Chalf, Cmid, Cout, H1, W1, H2, W2 = fused["dims"]
    N = x1_nchw.shape[0]
    assert x1_nchw.shape == (N, Cin, H1, W1)
    if tuple(x2_nchw.shape[2:]) != (H2, W2):
        # TODO(synk): bilinear (align_corners=False) resize fallback not implemented in Pallas.
        raise NotImplementedError("spatial mismatch -> bilinear resize not implemented")
    assert x2_nchw.shape[1] == Chalf

    # Channel-minor flattened rows (layout plumbing on the raw inputs only).
    x1r = jnp.transpose(x1_nchw, (0, 2, 3, 1)).reshape(N, H1, W1 * Cin).astype(jnp.float32)
    x2r = jnp.transpose(x2_nchw, (0, 2, 3, 1)).reshape(N, H2, W2 * Chalf).astype(jnp.float32)

    kernel = functools.partial(_fused_kernel, H1, W1, H2, W2, Chalf, Cmid, Cout)

    out = pl.pallas_call(
        kernel,
        out_shape=jax.ShapeDtypeStruct((N, H2, W2 * Cout), jnp.float32),
        grid=(N,),
        in_specs=[
            pl.BlockSpec((1, H1, W1 * Cin), lambda n: (n, 0, 0)),
            pl.BlockSpec((1, H2, W2 * Chalf), lambda n: (n, 0, 0)),
            pl.BlockSpec((2, W1 * Cin, W2 * Chalf), lambda n: (0, 0, 0)),
            pl.BlockSpec((1, W2 * Chalf), lambda n: (0, 0)),
            pl.BlockSpec((3, (W2 + 2) * Cin, W2 * Cmid), lambda n: (0, 0, 0)),
            pl.BlockSpec((1, W2 * Cmid), lambda n: (0, 0)),
            pl.BlockSpec((3, (W2 + 2) * Cmid, W2 * Cout), lambda n: (0, 0, 0)),
            pl.BlockSpec((1, W2 * Cout), lambda n: (0, 0)),
        ],
        out_specs=pl.BlockSpec((1, H2, W2 * Cout), lambda n: (n, 0, 0)),
        scratch_shapes=[
            pltpu.VMEM((H2 + 2, (W2 + 2) * Cin), jnp.float32),   # padded concat
            pltpu.VMEM((H2 + 2, (W2 + 2) * Cmid), jnp.float32),  # padded conv1 act
        ],
        compiler_params=pltpu.CompilerParams(
            dimension_semantics=("parallel",),       # 1 image / TensorCore on v7x
            vmem_limit_bytes=32 * 1024 * 1024,
        ),
    )(x1r, x2r, fused["wup"], fused["bup"], fused["bw1"], fused["b1"],
      fused["bw2"], fused["b2"])

    return jnp.transpose(out.reshape(N, H2, W2, Cout), (0, 3, 1, 2))   # NCHW


# ------------------------- pure-JAX reference (NCHW) ------------------------

def reference_forward(x1, x2, pt):
    y = jnp.einsum("nihw,ioab->nohawb", x1, pt["up_w"])     # (N,Chalf,H,2,W,2)
    N, Co, H, _, W, _ = y.shape
    y = y.reshape(N, Co, 2 * H, 2 * W) + pt["up_b"][None, :, None, None]
    x = jnp.concatenate([y, x2], axis=1)

    def conv(z, w, b):
        out = jax.lax.conv_general_dilated(
            z, w, (1, 1), ((1, 1), (1, 1)),
            dimension_numbers=("NCHW", "OIHW", "NCHW"))
        return jax.nn.relu(out + b[None, :, None, None])

    return conv(conv(x, pt["c1_w"], pt["c1_b"]), pt["c2_w"], pt["c2_b"])


# ---------------------------------- main ------------------------------------

if __name__ == "__main__":
    in_channels, out_channels = 8, 4
    chalf = in_channels // 2
    H1 = W1 = 8                                    # x1 spatial; x2 is 2x that

    key = jax.random.PRNGKey(0)
    ks = jax.random.split(key, 8)

    # Deterministic synthetic parameters (PyTorch layouts).
    up_w = 0.1 * jax.random.normal(ks[0], (in_channels, chalf, 2, 2), jnp.float32)
    up_b = 0.1 * jax.random.normal(ks[1], (chalf,), jnp.float32)
    c1_w = 0.1 * jax.random.normal(ks[2], (out_channels, in_channels, 3, 3), jnp.float32)
    c1_b = 0.1 * jax.random.normal(ks[3], (out_channels,), jnp.float32)
    c2_w = 0.1 * jax.random.normal(ks[4], (out_channels, out_channels, 3, 3), jnp.float32)
    c2_b = 0.1 * jax.random.normal(ks[5], (out_channels,), jnp.float32)

    fused = _build_fused_params(up_w, up_b, c1_w, c1_b, c2_w, c2_b, H1, W1)
    ref_params = {"up_w": up_w, "up_b": up_b,
                  "c1_w": c1_w, "c1_b": c1_b, "c2_w": c2_w, "c2_b": c2_b}

    # Inputs (NCHW, matching the PyTorch module).
    x1 = jax.random.normal(ks[6], (2, in_channels, H1, W1), jnp.float32)   # decoder feature
    x2 = jax.random.normal(ks[7], (2, chalf, 2 * H1, 2 * W1), jnp.float32)  # skip connection

    out = jax.block_until_ready(upsample_forward(x1, x2, fused))
    ref = jax.block_until_ready(reference_forward(x1, x2, ref_params))

    assert out.shape == ref.shape == (2, out_channels, 2 * H1, 2 * W1), out.shape
    np.testing.assert_allclose(np.asarray(out), np.asarray(ref), rtol=1e-2, atol=1e-2)

    print("KERNEL_OK")
</pallas_src>

<mosaic_0001>
module attributes {stable_mosaic.version = 11 : i64} {
  func.func @_fused_kernel(%arg0: i32, %arg1: memref<1x8x64xf32, #tpu.memory_space<vmem>>, %arg2: memref<1x16x64xf32, #tpu.memory_space<vmem>>, %arg3: memref<2x64x64xf32, #tpu.memory_space<vmem>>, %arg4: memref<1x64xf32, #tpu.memory_space<vmem>>, %arg5: memref<3x144x64xf32, #tpu.memory_space<vmem>>, %arg6: memref<1x64xf32, #tpu.memory_space<vmem>>, %arg7: memref<3x72x64xf32, #tpu.memory_space<vmem>>, %arg8: memref<1x64xf32, #tpu.memory_space<vmem>>, %arg9: memref<1x16x64xf32, #tpu.memory_space<vmem>>, %arg10: memref<18x144xf32, #tpu.memory_space<vmem>>, %arg11: memref<18x72xf32, #tpu.memory_space<vmem>>) attributes {dimension_semantics = [#tpu.dimension_semantics<parallel>], iteration_bounds = array<i64: 2>, scalar_prefetch = 0 : i64, scratch_operands = 2 : i64, tpu.core_type = #tpu.core_type<tc>, window_params = [{transform_indices = @transform_0, window_bounds = array<i64: 1, 8, 64>}, {transform_indices = @transform_1, window_bounds = array<i64: 1, 16, 64>}, {pipeline_mode = #tpu.pipeline_mode<synchronous>, transform_indices = @transform_2, window_bounds = array<i64: 2, 64, 64>}, {pipeline_mode = #tpu.pipeline_mode<synchronous>, transform_indices = @transform_3, window_bounds = array<i64: 1, 64>}, {pipeline_mode = #tpu.pipeline_mode<synchronous>, transform_indices = @transform_4, window_bounds = array<i64: 3, 144, 64>}, {pipeline_mode = #tpu.pipeline_mode<synchronous>, transform_indices = @transform_5, window_bounds = array<i64: 1, 64>}, {pipeline_mode = #tpu.pipeline_mode<synchronous>, transform_indices = @transform_6, window_bounds = array<i64: 3, 72, 64>}, {pipeline_mode = #tpu.pipeline_mode<synchronous>, transform_indices = @transform_7, window_bounds = array<i64: 1, 64>}, {transform_indices = @transform_8, window_bounds = array<i64: 1, 16, 64>}]} {
    %cst = arith.constant 0.000000e+00 : f32
    %0 = vector.broadcast %cst : f32 to vector<18x144xf32>
    %c0 = arith.constant 0 : index
    %c0_0 = arith.constant 0 : index
    %1 = vector.load %arg10[%c0, %c0_0] : memref<18x144xf32, #tpu.memory_space<vmem>>, vector<18x144xf32>
    tpu.vector_store %arg10[%c0, %c0_0], %0 {strides = array<i32>} : memref<18x144xf32, #tpu.memory_space<vmem>>, vector<18x144xf32>,
    %cst_1 = arith.constant 0.000000e+00 : f32
    %2 = vector.broadcast %cst_1 : f32 to vector<18x72xf32>
    %c0_2 = arith.constant 0 : index
    %c0_3 = arith.constant 0 : index
    %3 = vector.load %arg11[%c0_2, %c0_3] : memref<18x72xf32, #tpu.memory_space<vmem>>, vector<18x72xf32>
    tpu.vector_store %arg11[%c0_2, %c0_3], %2 {strides = array<i32>} : memref<18x72xf32, #tpu.memory_space<vmem>>, vector<18x72xf32>,
    %c0_4 = arith.constant 0 : index
    %c0_5 = arith.constant 0 : index
    %c0_6 = arith.constant 0 : index
    %4 = vector.load %arg1[%c0_4, %c0_5, %c0_6] : memref<1x8x64xf32, #tpu.memory_space<vmem>>, vector<1x8x64xf32>
    %5 = vector.shape_cast %4 : vector<1x8x64xf32> to vector<8x64xf32>
    %c0_7 = arith.constant 0 : index
    %c0_8 = arith.constant 0 : index
    %c0_9 = arith.constant 0 : index
    %6 = vector.load %arg3[%c0_7, %c0_8, %c0_9] : memref<2x64x64xf32, #tpu.memory_space<vmem>>, vector<1x64x64xf32>
    %7 = vector.shape_cast %6 : vector<1x64x64xf32> to vector<64x64xf32>
    %cst_10 = arith.constant dense<0.000000e+00> : vector<8x64xf32>
    %8 = tpu.matmul %5, %7, %cst_10 {dimension_numbers = #tpu.dot_dimension_numbers<[1], [0], [0], [1], [0, 0, 1, 1], [], []>} : vector<8x64xf32>, vector<64x64xf32>, vector<8x64xf32> -> vector<8x64xf32>
    %c0_11 = arith.constant 0 : index
    %c0_12 = arith.constant 0 : index
    %9 = vector.load %arg4[%c0_11, %c0_12] : memref<1x64xf32, #tpu.memory_space<vmem>>, vector<1x64xf32>
    %10 = vector.broadcast %9 : vector<1x64xf32> to vector<8x64xf32>
    %11 = arith.addf %8, %10 : vector<8x64xf32>
    %12 = vector.extract_strided_slice %11 {offsets = [0, 0], sizes = [1, 64], strides = [1, 1]} : vector<8x64xf32> to vector<1x64xf32>
    %c1 = arith.constant 1 : index
    %c4 = arith.constant 4 : index
    %13 = vector.load %arg10[%c1, %c4] : memref<18x144xf32, #tpu.memory_space<vmem>>, vector<1x64xf32>
    tpu.vector_store %arg10[%c1, %c4], %12 {strides = array<i32>} : memref<18x144xf32, #tpu.memory_space<vmem>>, vector<1x64xf32>,
    %14 = vector.extract_strided_slice %11 {offsets = [1, 0], sizes = [1, 64], strides = [1, 1]} : vector<8x64xf32> to vector<1x64xf32>
    %c3 = arith.constant 3 : index
    %c4_13 = arith.constant 4 : index
    %15 = vector.load %arg10[%c3, %c4_13] : memref<18x144xf32, #tpu.memory_space<vmem>>, vector<1x64xf32>
    tpu.vector_store %arg10[%c3, %c4_13], %14 {strides = array<i32>} : memref<18x144xf32, #tpu.memory_space<vmem>>, vector<1x64xf32>,
    %16 = vector.extract_strided_slice %11 {offsets = [2, 0], sizes = [1, 64], strides = [1, 1]} : vector<8x64xf32> to vector<1x64xf32>
    %c5 = arith.constant 5 : index
    %c4_14 = arith.constant 4 : index
    %17 = vector.load %arg10[%c5, %c4_14] : memref<18x144xf32, #tpu.memory_space<vmem>>, vector<1x64xf32>
    tpu.vector_store %arg10[%c5, %c4_14], %16 {strides = array<i32>} : memref<18x144xf32, #tpu.memory_space<vmem>>, vector<1x64xf32>,
    %18 = vector.extract_strided_slice %11 {offsets = [3, 0], sizes = [1, 64], strides = [1, 1]} : vector<8x64xf32> to vector<1x64xf32>
    %c7 = arith.constant 7 : index
    %c4_15 = arith.constant 4 : index
    %19 = vector.load %arg10[%c7, %c4_15] : memref<18x144xf32, #tpu.memory_space<vmem>>, vector<1x64xf32>
    tpu.vector_store %arg10[%c7, %c4_15], %18 {strides = array<i32>} : memref<18x144xf32, #tpu.memory_space<vmem>>, vector<1x64xf32>,
    %20 = vector.extract_strided_slice %11 {offsets = [4, 0], sizes = [1, 64], strides = [1, 1]} : vector<8x64xf32> to vector<1x64xf32>
    %c9 = arith.constant 9 : index
    %c4_16 = arith.constant 4 : index
    %21 = vector.load %arg10[%c9, %c4_16] : memref<18x144xf32, #tpu.memory_space<vmem>>, vector<1x64xf32>
    tpu.vector_store %arg10[%c9, %c4_16], %20 {strides = array<i32>} : memref<18x144xf32, #tpu.memory_space<vmem>>, vector<1x64xf32>,
    %22 = vector.extract_strided_slice %11 {offsets = [5, 0], sizes = [1, 64], strides = [1, 1]} : vector<8x64xf32> to vector<1x64xf32>
    %c11 = arith.constant 11 : index
    %c4_17 = arith.constant 4 : index
    %23 = vector.load %arg10[%c11, %c4_17] : memref<18x144xf32, #tpu.memory_space<vmem>>, vector<1x64xf32>
    tpu.vector_store %arg10[%c11, %c4_17], %22 {strides = array<i32>} : memref<18x144xf32, #tpu.memory_space<vmem>>, vector<1x64xf32>,
    %24 = vector.extract_strided_slice %11 {offsets = [6, 0], sizes = [1, 64], strides = [1, 1]} : vector<8x64xf32> to vector<1x64xf32>
    %c13 = arith.constant 13 : index
    %c4_18 = arith.constant 4 : index
    %25 = vector.load %arg10[%c13, %c4_18] : memref<18x144xf32, #tpu.memory_space<vmem>>, vector<1x64xf32>
    tpu.vector_store %arg10[%c13, %c4_18], %24 {strides = array<i32>} : memref<18x144xf32, #tpu.memory_space<vmem>>, vector<1x64xf32>,
    %26 = vector.extract_strided_slice %11 {offsets = [7, 0], sizes = [1, 64], strides = [1, 1]} : vector<8x64xf32> to vector<1x64xf32>
    %c15 = arith.constant 15 : index
    %c4_19 = arith.constant 4 : index
    %27 = vector.load %arg10[%c15, %c4_19] : memref<18x144xf32, #tpu.memory_space<vmem>>, vector<1x64xf32>
    tpu.vector_store %arg10[%c15, %c4_19], %26 {strides = array<i32>} : memref<18x144xf32, #tpu.memory_space<vmem>>, vector<1x64xf32>,
    %c1_20 = arith.constant 1 : index
    %c0_21 = arith.constant 0 : index
    %c0_22 = arith.constant 0 : index
    %28 = vector.load %arg3[%c1_20, %c0_21, %c0_22] : memref<2x64x64xf32, #tpu.memory_space<vmem>>, vector<1x64x64xf32>
    %29 = vector.shape_cast %28 : vector<1x64x64xf32> to vector<64x64xf32>
    %cst_23 = arith.constant dense<0.000000e+00> : vector<8x64xf32>
    %30 = tpu.matmul %5, %29, %cst_23 {dimension_numbers = #tpu.dot_dimension_numbers<[1], [0], [0], [1], [0, 0, 1, 1], [], []>} : vector<8x64xf32>, vector<64x64xf32>, vector<8x64xf32> -> vector<8x64xf32>
    %c0_24 = arith.constant 0 : index
    %c0_25 = arith.constant 0 : index
    %31 = vector.load %arg4[%c0_24, %c0_25] : memref<1x64xf32, #tpu.memory_space<vmem>>, vector<1x64xf32>
    %32 = vector.broadcast %31 : vector<1x64xf32> to vector<8x64xf32>
    %33 = arith.addf %30, %32 : vector<8x64xf32>
    %34 = vector.extract_strided_slice %33 {offsets = [0, 0], sizes = [1, 64], strides = [1, 1]} : vector<8x64xf32> to vector<1x64xf32>
    %c2 = arith.constant 2 : index
    %c4_26 = arith.constant 4 : index
    %35 = vector.load %arg10[%c2, %c4_26] : memref<18x144xf32, #tpu.memory_space<vmem>>, vector<1x64xf32>
    tpu.vector_store %arg10[%c2, %c4_26], %34 {strides = array<i32>} : memref<18x144xf32, #tpu.memory_space<vmem>>, vector<1x64xf32>,
    %36 = vector.extract_strided_slice %33 {offsets = [1, 0], sizes = [1, 64], strides = [1, 1]} : vector<8x64xf32> to vector<1x64xf32>
    %c4_27 = arith.constant 4 : index
    %c4_28 = arith.constant 4 : index
    %37 = vector.load %arg10[%c4_27, %c4_28] : memref<18x144xf32, #tpu.memory_space<vmem>>, vector<1x64xf32>
    tpu.vector_store %arg10[%c4_27, %c4_28], %36 {strides = array<i32>} : memref<18x144xf32, #tpu.memory_space<vmem>>, vector<1x64xf32>,
    %38 = vector.extract_strided_slice %33 {offsets = [2, 0], sizes = [1, 64], strides = [1, 1]} : vector<8x64xf32> to vector<1x64xf32>
    %c6 = arith.constant 6 : index
    %c4_29 = arith.constant 4 : index
    %39 = vector.load %arg10[%c6, %c4_29] : memref<18x144xf32, #tpu.memory_space<vmem>>, vector<1x64xf32>
    tpu.vector_store %arg10[%c6, %c4_29], %38 {strides = array<i32>} : memref<18x144xf32, #tpu.memory_space<vmem>>, vector<1x64xf32>,
    %40 = vector.extract_strided_slice %33 {offsets = [3, 0], sizes = [1, 64], strides = [1, 1]} : vector<8x64xf32> to vector<1x64xf32>
    %c8 = arith.constant 8 : index
    %c4_30 = arith.constant 4 : index
    %41 = vector.load %arg10[%c8, %c4_30] : memref<18x144xf32, #tpu.memory_space<vmem>>, vector<1x64xf32>
    tpu.vector_store %arg10[%c8, %c4_30], %40 {strides = array<i32>} : memref<18x144xf32, #tpu.memory_space<vmem>>, vector<1x64xf32>,
    %42 = vector.extract_strided_slice %33 {offsets = [4, 0], sizes = [1, 64], strides = [1, 1]} : vector<8x64xf32> to vector<1x64xf32>
    %c10 = arith.constant 10 : index
    %c4_31 = arith.constant 4 : index
    %43 = vector.load %arg10[%c10, %c4_31] : memref<18x144xf32, #tpu.memory_space<vmem>>, vector<1x64xf32>
    tpu.vector_store %arg10[%c10, %c4_31], %42 {strides = array<i32>} : memref<18x144xf32, #tpu.memory_space<vmem>>, vector<1x64xf32>,
    %44 = vector.extract_strided_slice %33 {offsets = [5, 0], sizes = [1, 64], strides = [1, 1]} : vector<8x64xf32> to vector<1x64xf32>
    %c12 = arith.constant 12 : index
    %c4_32 = arith.constant 4 : index
    %45 = vector.load %arg10[%c12, %c4_32] : memref<18x144xf32, #tpu.memory_space<vmem>>, vector<1x64xf32>
    tpu.vector_store %arg10[%c12, %c4_32], %44 {strides = array<i32>} : memref<18x144xf32, #tpu.memory_space<vmem>>, vector<1x64xf32>,
    %46 = vector.extract_strided_slice %33 {offsets = [6, 0], sizes = [1, 64], strides = [1, 1]} : vector<8x64xf32> to vector<1x64xf32>
    %c14 = arith.constant 14 : index
    %c4_33 = arith.constant 4 : index
    %47 = vector.load %arg10[%c14, %c4_33] : memref<18x144xf32, #tpu.memory_space<vmem>>, vector<1x64xf32>
    tpu.vector_store %arg10[%c14, %c4_33], %46 {strides = array<i32>} : memref<18x144xf32, #tpu.memory_space<vmem>>, vector<1x64xf32>,
    %48 = vector.extract_strided_slice %33 {offsets = [7, 0], sizes = [1, 64], strides = [1, 1]} : vector<8x64xf32> to vector<1x64xf32>
    %c16 = arith.constant 16 : index
    %c4_34 = arith.constant 4 : index
    %49 = vector.load %arg10[%c16, %c4_34] : memref<18x144xf32, #tpu.memory_space<vmem>>, vector<1x64xf32>
    tpu.vector_store %arg10[%c16, %c4_34], %48 {strides = array<i32>} : memref<18x144xf32, #tpu.memory_space<vmem>>, vector<1x64xf32>,
    %c0_35 = arith.constant 0 : index
    %c0_36 = arith.constant 0 : index
    %c0_37 = arith.constant 0 : index
    %50 = vector.load %arg2[%c0_35, %c0_36, %c0_37] : memref<1x16x64xf32, #tpu.memory_space<vmem>>, vector<1x16x64xf32>
    %51 = vector.shape_cast %50 : vector<1x16x64xf32> to vector<16x64xf32>
    %c1_38 = arith.constant 1 : index
    %c76 = arith.constant 76 : index
    %52 = vector.load %arg10[%c1_38, %c76] : memref<18x144xf32, #tpu.memory_space<vmem>>, vector<16x64xf32>
    tpu.vector_store %arg10[%c1_38, %c76], %51 {strides = array<i32>} : memref<18x144xf32, #tpu.memory_space<vmem>>, vector<16x64xf32>,
    %cst_39 = arith.constant 0.000000e+00 : f32
    %53 = vector.broadcast %cst_39 : f32 to vector<16x64xf32>
    %c0_40 = arith.constant 0 : index
    %c0_41 = arith.constant 0 : index
    %54 = vector.load %arg10[%c0_40, %c0_41] : memref<18x144xf32, #tpu.memory_space<vmem>>, vector<16x144xf32>
    %c0_42 = arith.constant 0 : index
    %c0_43 = arith.constant 0 : index
    %c0_44 = arith.constant 0 : index
    %55 = vector.load %arg5[%c0_42, %c0_43, %c0_44] : memref<3x144x64xf32, #tpu.memory_space<vmem>>, vector<1x144x64xf32>
    %56 = vector.shape_cast %55 : vector<1x144x64xf32> to vector<144x64xf32>
    %cst_45 = arith.constant dense<0.000000e+00> : vector<16x64xf32>
    %57 = tpu.matmul %54, %56, %cst_45 {dimension_numbers = #tpu.dot_dimension_numbers<[1], [0], [0], [1], [0, 0, 1, 1], [], []>} : vector<16x144xf32>, vector<144x64xf32>, vector<16x64xf32> -> vector<16x64xf32>
    %58 = arith.addf %53, %57 : vector<16x64xf32>
    %c1_46 = arith.constant 1 : index
    %c0_47 = arith.constant 0 : index
    %59 = vector.load %arg10[%c1_46, %c0_47] : memref<18x144xf32, #tpu.memory_space<vmem>>, vector<16x144xf32>
    %c1_48 = arith.constant 1 : index
    %c0_49 = arith.constant 0 : index
    %c0_50 = arith.constant 0 : index
    %60 = vector.load %arg5[%c1_48, %c0_49, %c0_50] : memref<3x144x64xf32, #tpu.memory_space<vmem>>, vector<1x144x64xf32>
    %61 = vector.shape_cast %60 : vector<1x144x64xf32> to vector<144x64xf32>
    %cst_51 = arith.constant dense<0.000000e+00> : vector<16x64xf32>
    %62 = tpu.matmul %59, %61, %cst_51 {dimension_numbers = #tpu.dot_dimension_numbers<[1], [0], [0], [1], [0, 0, 1, 1], [], []>} : vector<16x144xf32>, vector<144x64xf32>, vector<16x64xf32> -> vector<16x64xf32>
    %63 = arith.addf %58, %62 : vector<16x64xf32>
    %c2_52 = arith.constant 2 : index
    %c0_53 = arith.constant 0 : index
    %64 = vector.load %arg10[%c2_52, %c0_53] : memref<18x144xf32, #tpu.memory_space<vmem>>, vector<16x144xf32>
    %c2_54 = arith.constant 2 : index
    %c0_55 = arith.constant 0 : index
    %c0_56 = arith.constant 0 : index
    %65 = vector.load %arg5[%c2_54, %c0_55, %c0_56] : memref<3x144x64xf32, #tpu.memory_space<vmem>>, vector<1x144x64xf32>
    %66 = vector.shape_cast %65 : vector<1x144x64xf32> to vector<144x64xf32>
    %cst_57 = arith.constant dense<0.000000e+00> : vector<16x64xf32>
    %67 = tpu.matmul %64, %66, %cst_57 {dimension_numbers = #tpu.dot_dimension_numbers<[1], [0], [0], [1], [0, 0, 1, 1], [], []>} : vector<16x144xf32>, vector<144x64xf32>, vector<16x64xf32> -> vector<16x64xf32>
    %68 = arith.addf %63, %67 : vector<16x64xf32>
    %c0_58 = arith.constant 0 : index
    %c0_59 = arith.constant 0 : index
    %69 = vector.load %arg6[%c0_58, %c0_59] : memref<1x64xf32, #tpu.memory_space<vmem>>, vector<1x64xf32>
    %70 = vector.broadcast %69 : vector<1x64xf32> to vector<16x64xf32>
    %71 = arith.addf %68, %70 : vector<16x64xf32>
    %cst_60 = arith.constant 0.000000e+00 : f32
    %72 = vector.broadcast %cst_60 : f32 to vector<16x64xf32>
    %73 = arith.maximumf %71, %72 : vector<16x64xf32>
    %c1_61 = arith.constant 1 : index
    %c4_62 = arith.constant 4 : index
    %74 = vector.load %arg11[%c1_61, %c4_62] : memref<18x72xf32, #tpu.memory_space<vmem>>, vector<16x64xf32>
    tpu.vector_store %arg11[%c1_61, %c4_62], %73 {strides = array<i32>} : memref<18x72xf32, #tpu.memory_space<vmem>>, vector<16x64xf32>,
    %cst_63 = arith.constant 0.000000e+00 : f32
    %75 = vector.broadcast %cst_63 : f32 to vector<16x64xf32>
    %c0_64 = arith.constant 0 : index
    %c0_65 = arith.constant 0 : index
    %76 = vector.load %arg11[%c0_64, %c0_65] : memref<18x72xf32, #tpu.memory_space<vmem>>, vector<16x72xf32>
    %c0_66 = arith.constant 0 : index
    %c0_67 = arith.constant 0 : index
    %c0_68 = arith.constant 0 : index
    %77 = vector.load %arg7[%c0_66, %c0_67, %c0_68] : memref<3x72x64xf32, #tpu.memory_space<vmem>>, vector<1x72x64xf32>
    %78 = vector.shape_cast %77 : vector<1x72x64xf32> to vector<72x64xf32>
    %cst_69 = arith.constant dense<0.000000e+00> : vector<16x64xf32>
    %79 = tpu.matmul %76, %78, %cst_69 {dimension_numbers = #tpu.dot_dimension_numbers<[1], [0], [0], [1], [0, 0, 1, 1], [], []>} : vector<16x72xf32>, vector<72x64xf32>, vector<16x64xf32> -> vector<16x64xf32>
    %80 = arith.addf %75, %79 : vector<16x64xf32>
    %c1_70 = arith.constant 1 : index
    %c0_71 = arith.constant 0 : index
    %81 = vector.load %arg11[%c1_70, %c0_71] : memref<18x72xf32, #tpu.memory_space<vmem>>, vector<16x72xf32>
    %c1_72 = arith.constant 1 : index
    %c0_73 = arith.constant 0 : index
    %c0_74 = arith.constant 0 : index
    %82 = vector.load %arg7[%c1_72, %c0_73, %c0_74] : memref<3x72x64xf32, #tpu.memory_space<vmem>>, vector<1x72x64xf32>
    %83 = vector.shape_cast %82 : vector<1x72x64xf32> to vector<72x64xf32>
    %cst_75 = arith.constant dense<0.000000e+00> : vector<16x64xf32>
    %84 = tpu.matmul %81, %83, %cst_75 {dimension_numbers = #tpu.dot_dimension_numbers<[1], [0], [0], [1], [0, 0, 1, 1], [], []>} : vector<16x72xf32>, vector<72x64xf32>, vector<16x64xf32> -> vector<16x64xf32>
    %85 = arith.addf %80, %84 : vector<16x64xf32>
    %c2_76 = arith.constant 2 : index
    %c0_77 = arith.constant 0 : index
    %86 = vector.load %arg11[%c2_76, %c0_77] : memref<18x72xf32, #tpu.memory_space<vmem>>, vector<16x72xf32>
    %c2_78 = arith.constant 2 : index
    %c0_79 = arith.constant 0 : index
    %c0_80 = arith.constant 0 : index
    %87 = vector.load %arg7[%c2_78, %c0_79, %c0_80] : memref<3x72x64xf32, #tpu.memory_space<vmem>>, vector<1x72x64xf32>
    %88 = vector.shape_cast %87 : vector<1x72x64xf32> to vector<72x64xf32>
    %cst_81 = arith.constant dense<0.000000e+00> : vector<16x64xf32>
    %89 = tpu.matmul %86, %88, %cst_81 {dimension_numbers = #tpu.dot_dimension_numbers<[1], [0], [0], [1], [0, 0, 1, 1], [], []>} : vector<16x72xf32>, vector<72x64xf32>, vector<16x64xf32> -> vector<16x64xf32>
    %90 = arith.addf %85, %89 : vector<16x64xf32>
    %c0_82 = arith.constant 0 : index
    %c0_83 = arith.constant 0 : index
    %91 = vector.load %arg8[%c0_82, %c0_83] : memref<1x64xf32, #tpu.memory_space<vmem>>, vector<1x64xf32>
    %92 = vector.broadcast %91 : vector<1x64xf32> to vector<16x64xf32>
    %93 = arith.addf %90, %92 : vector<16x64xf32>
    %cst_84 = arith.constant 0.000000e+00 : f32
    %94 = vector.broadcast %cst_84 : f32 to vector<16x64xf32>
    %95 = arith.maximumf %93, %94 : vector<16x64xf32>
    %c0_85 = arith.constant 0 : index
    %c0_86 = arith.constant 0 : index
    %c0_87 = arith.constant 0 : index
    %96 = vector.load %arg9[%c0_85, %c0_86, %c0_87] : memref<1x16x64xf32, #tpu.memory_space<vmem>>, vector<1x16x64xf32>
    %97 = vector.shape_cast %96 : vector<1x16x64xf32> to vector<16x64xf32>
    %98 = vector.shape_cast %95 : vector<16x64xf32> to vector<1x16x64xf32>
    tpu.vector_store %arg9[%c0_85, %c0_86, %c0_87], %98 {strides = array<i32>} : memref<1x16x64xf32, #tpu.memory_space<vmem>>, vector<1x16x64xf32>,
    return
  }
  func.func @transform_0(%arg0: i32) -> (i32, i32, i32) {
    %c0_i32 = arith.constant 0 : i32
    %c0_i32_0 = arith.constant 0 : i32
    %c0_i32_1 = arith.constant 0 : i32
    return %arg0, %c0_i32, %c0_i32_0 : i32, i32, i32
  }
  func.func @transform_1(%arg0: i32) -> (i32, i32, i32) {
    %c0_i32 = arith.constant 0 : i32
    %c0_i32_0 = arith.constant 0 : i32
    %c0_i32_1 = arith.constant 0 : i32
    return %arg0, %c0_i32, %c0_i32_0 : i32, i32, i32
  }
  func.func @transform_2(%arg0: i32) -> (i32, i32, i32) {
    %c0_i32 = arith.constant 0 : i32
    %c0_i32_0 = arith.constant 0 : i32
    %c0_i32_1 = arith.constant 0 : i32
    %c0_i32_2 = arith.constant 0 : i32
    return %c0_i32, %c0_i32_0, %c0_i32_1 : i32, i32, i32
  }
  func.func @transform_3(%arg0: i32) -> (i32, i32) {
    %c0_i32 = arith.constant 0 : i32
    %c0_i32_0 = arith.constant 0 : i32
    %c0_i32_1 = arith.constant 0 : i32
    return %c0_i32, %c0_i32_0 : i32, i32
  }
  func.func @transform_4(%arg0: i32) -> (i32, i32, i32) {
    %c0_i32 = arith.constant 0 : i32
    %c0_i32_0 = arith.constant 0 : i32
    %c0_i32_1 = arith.constant 0 : i32
    %c0_i32_2 = arith.constant 0 : i32
    return %c0_i32, %c0_i32_0, %c0_i32_1 : i32, i32, i32
  }
  func.func @transform_5(%arg0: i32) -> (i32, i32) {
    %c0_i32 = arith.constant 0 : i32
    %c0_i32_0 = arith.constant 0 : i32
    %c0_i32_1 = arith.constant 0 : i32
    return %c0_i32, %c0_i32_0 : i32, i32
  }
  func.func @transform_6(%arg0: i32) -> (i32, i32, i32) {
    %c0_i32 = arith.constant 0 : i32
    %c0_i32_0 = arith.constant 0 : i32
    %c0_i32_1 = arith.constant 0 : i32
    %c0_i32_2 = arith.constant 0 : i32
    return %c0_i32, %c0_i32_0, %c0_i32_1 : i32, i32, i32
  }
  func.func @transform_7(%arg0: i32) -> (i32, i32) {
    %c0_i32 = arith.constant 0 : i32
    %c0_i32_0 = arith.constant 0 : i32
    %c0_i32_1 = arith.constant 0 : i32
    return %c0_i32, %c0_i32_0 : i32, i32
  }
  func.func @transform_8(%arg0: i32) -> (i32, i32, i32) {
    %c0_i32 = arith.constant 0 : i32
    %c0_i32_0 = arith.constant 0 : i32
    %c0_i32_1 = arith.constant 0 : i32
    return %arg0, %c0_i32, %c0_i32_0 : i32, i32, i32
  }
}

</mosaic_0001>

<bundles_post_ra>
// kernel: tpu_custom_call.1
= control target key start
LH: loop header
LB: loop body
LE: loop exit
PB: predicated region body
PF: predicated region fallthrough
CT: control target
= control target key end

     0   :  { %13 = vsyncpa [#allocation5], 0  ;;  %s2484_s0 = inlined_call_operand.vmem [shape: f32[2,8,64], index: 0, kind: input, shape index: {}]   ;;  %s2485_s1 = inlined_call_operand.vmem [shape: f32[2,16,64], index: 1, kind: input, shape index: {}]   ;;  %s2486_s2 = inlined_call_operand.vmem [shape: f32[2,64,64], index: 2, kind: input, shape index: {}]   ;;  %s2487_s3 = inlined_call_operand.vmem [shape: f32[1,64], index: 3, kind: input, shape index: {}]   ;;  %s2488_s4 = inlined_call_operand.vmem [shape: f32[3,144,64], index: 4, kind: input, shape index: {}]   ;;  %s2489_s5 = inlined_call_operand.vmem [shape: f32[1,64], index: 5, kind: input, shape index: {}]   ;;  %s2490_s6 = inlined_call_operand.vmem [shape: f32[3,72,64], index: 6, kind: input, shape index: {}]   ;;  %s2491_s7 = inlined_call_operand.vmem [shape: f32[1,64], index: 7, kind: input, shape index: {}]   ;;  %s2492_s8 = inlined_call_operand.hbm [shape: f32[2,16,64], index: 8, kind: output, shape index: {}]  }
   0x1   :  { %15 = vsyncpa [#allocation5 + $0x1], 0  ;;  %s1934_s27 = smov 0   ;;  %s1936_s28 = smov 0  }
   0x2   :  { %s1938_s29 = smov 0   ;;  %s1940_s30 = smov 0  }
   0x3 LB: > { %s1955_s9 = sadd.s32 4294967295, %s1879_s30   ;;  %s1367_s10 = sadd.s32 4294967294, %s1879_s30   ;;  %s1879_s30 = sphi %s1940_s30, %s2498_s30   ;;  %s1875_s29 = sphi %s1938_s29, %s2497_s29   ;;  %s1871_s28 = sphi %s1936_s28, %s2496_s28   ;;  %s1867_s27 = sphi %s1934_s27, %s2495_s27  }
   0x4   : > { %s1959_s11 = sadd.s32 1, %s1879_s30   ;;  %s206_s12 = sadd.s32 1, %s1875_s29 }
   0x5   : > { %s203_s13 = ssub.s32 %s1879_s30, %s1959_s11  ;;  %p216_p0 = scmp.ne.s32.totalorder %s1875_s29, %s1871_s28 }
   0x6   : > { %p204_p1 = scmp.eq.s32.totalorder %s203_s13, 0  ;;  %p217_p2 = scmp.eq.s32.totalorder %s1955_s9, 1 }
   0x7   : > { %p222_p3 = scmp.ne.s32.totalorder %s1871_s28, %s1867_s27  ;;  %p223_p4 = scmp.eq.s32.totalorder %s1367_s10, 1 }
   0x8   : > { %s1970_s14 = scalar_select %p204_p1, %s1875_s29, %s206_s12  }
   0x9   : > { %p1972_p5 = por %p217_p2, %p216_p0  ;;  %p1976_p6 = por %p223_p4, %p222_p3 }
   0xa   : > { %p1370_p7 = scmp.ge.s32.totalorder %s1879_s30, 1  ;;  %p274_p8 = scmp.lt.s32.totalorder %s1879_s30, 3 }
   0xc   : > { %p275_p9 = pnand %p1370_p7, %p274_p8 }
   0xd   : > { %v335_v0 = vld [vmem:[%s2486_s2] sm:$0xff] (!%p275_p9)  ;;  %v336_v1 = vld [vmem:[%s2486_s2 + $0x8] sm:$0xff] (!%p275_p9)  ;;  %v1881_v3 = vmov (!%p275_p9), 0.0|0.0   ;;  %v337_v6 = vld [vmem:[%s2486_s2 + $0x10] sm:$0xff] (!%p275_p9)  ;;  %v1882_v8 = vmov (!%p275_p9), 0.0   ;;  %p312_p10 = scmp.lt.s32.totalorder (!%p275_p9), %s1955_s9, 1 }
   0xe   : > { %278 = sbr.rel (%p275_p9) target bundleno = 1054 (0x41e), region = 52  ;;  %v1377_v2 = vld [vmem:[%s2486_s2 + $0x40] sm:$0xff] (!%p275_p9)  ;;  %1614 = vmatprep.subr.bf16.mxu0 (!%p275_p9), %v1881_v3  ;;  %v1615_v4 = vpack.c.bf16 (!%p275_p9), %v336_v1, %v335_v0  ;;  %1626 = vmatprep.subr.bf16.mxu1 (!%p275_p9), %v1881_v3  ;;  %v1378_v5 = vld [vmem:[%s2486_s2 + $0x48] sm:$0xff] (!%p275_p9)  ;;  %v338_v7 = vld [vmem:[%s2486_s2 + $0x18] sm:$0xff] (!%p275_p9)  ;;  %321 = vst [vmem:[#allocation2] sm:$0xff] (!%p275_p9), %v1882_v8  ;;  %vm1883_vm0 = vmmov (!%p275_p9), 0  }
   0xf   : > { %324 = vst [vmem:[#allocation2 + $0x10] sm:$0xff] (!%p275_p9), %v1882_v8  ;;  %326 = vst [vmem:[#allocation2 + $0x20] sm:$0x3] (!%p275_p9), %v1882_v8  ;;  %v1627_v9 = vpack.c.bf16 (!%p275_p9), %v1378_v5, %v1377_v2  ;;  %v1379_v10 = vld [vmem:[%s2486_s2 + $0x50] sm:$0xff] (!%p275_p9)  ;;  %v1380_v11 = vld [vmem:[%s2486_s2 + $0x58] sm:$0xff] (!%p275_p9)  ;;  %1529 = vmatprep.mubr.msk.f32.mxu0 (!%p275_p9), %vm1883_vm0, %v1882_v8  ;;  %1548 = vmatprep.mubr.msk.f32.mxu1 (!%p275_p9), %vm1883_vm0, %v1882_v8  ;;  %v1618_v12 = vpack.c.bf16 (!%p275_p9), %v338_v7, %v337_v6  ;;  %vm350_vm1 = vcmask (!%p275_p9), 523264  }
  0x10   : > { %1616 = vmatpush3.bf16.msra.mxu0 (!%p275_p9), %v1615_v4  ;;  %v1630_v13 = vpack.c.bf16 (!%p275_p9), %v1380_v11, %v1379_v10  ;;  %v339_v14 = vld [vmem:[%s2486_s2 + $0x20] sm:$0xff] (!%p275_p9)  ;;  %v340_v15 = vld [vmem:[%s2486_s2 + $0x28] sm:$0xff] (!%p275_p9)  ;;  %v341_v20 = vld [vmem:[%s2486_s2 + $0x30] sm:$0xff] (!%p275_p9)  ;;  %s1884_s26 = smov (!%p275_p9), 4   ;;  %vm322_vm2 = vcmask (!%p275_p9), 130048   ;;  %vm327_vm3 = vcmask (!%p275_p9), 123904  }
  0x11   : > { %1617 = vmatprep.subr.bf16.mxu0 (!%p275_p9), %v1881_v3  ;;  %1628 = vmatpush3.bf16.msra.mxu1 (!%p275_p9), %v1627_v9  ;;  %v1381_v16 = vld [vmem:[%s2486_s2 + $0x60] sm:$0xff] (!%p275_p9)  ;;  %v1382_v17 = vld [vmem:[%s2486_s2 + $0x68] sm:$0xff] (!%p275_p9)  ;;  %v1621_v18 = vpack.c.bf16 (!%p275_p9), %v340_v15, %v339_v14  ;;  %v342_v21 = vld [vmem:[%s2486_s2 + $0x38] sm:$0xff] (!%p275_p9)  ;;  %323 = vst.msk [vmem:[#allocation2 + $0x8] sm:$0xff] (!%p275_p9), %vm322_vm2, %v1882_v8  ;;  %vm595_vm4 = vcmask (!%p275_p9), 1040384   ;;  %vm428_vm5 = vcmask (!%p275_p9), 548896  }
  0x12   : > { %1629 = vmatprep.subr.bf16.mxu1 (!%p275_p9), %v1881_v3  ;;  %v1633_v19 = vpack.c.bf16 (!%p275_p9), %v1382_v17, %v1381_v16  ;;  %v1383_v22 = vld [vmem:[%s2486_s2 + $0x70] sm:$0xff] (!%p275_p9)  ;;  %v1384_v23 = vld [vmem:[%s2486_s2 + $0x78] sm:$0xff] (!%p275_p9)  ;;  %v1624_v24 = vpack.c.bf16 (!%p275_p9), %v342_v21, %v341_v20  ;;  %v624_v27 = vld [vmem:[%s2488_s4] sm:$0xff] (!%p275_p9)  ;;  %325 = vst.msk [vmem:[#allocation2 + $0x18] sm:$0xff] (!%p275_p9), %vm322_vm2, %v1882_v8  ;;  %vm608_vm6 = vcmask (!%p275_p9), 1048161   ;;  %vm610_vm7 = vcmask (!%p275_p9), 97281  }
  0x13   : > { %v1636_v25 = vpack.c.bf16 (!%p275_p9), %v1384_v23, %v1383_v22  ;;  %v625_v28 = vld [vmem:[%s2488_s4 + $0x8] sm:$0xff] (!%p275_p9)  ;;  %v1387_v30 = vld [vmem:[%s2488_s4 + $0x90] sm:$0xff] (!%p275_p9)  ;;  %v1388_v31 = vld [vmem:[%s2488_s4 + $0x98] sm:$0xff] (!%p275_p9)  ;;  %328 = vst.msk [vmem:[#allocation2 + $0x28] sm:$0x3] (!%p275_p9), %vm327_vm3, %v1882_v8  ;;  %vm612_vm8 = vcmask (!%p275_p9), 1048160  }
  0x14   : > { %1619 = vmatpush3.bf16.msra.mxu0 (!%p275_p9), %v1618_v12  ;;  %v1666_v29 = vpack.c.bf16 (!%p275_p9), %v625_v28, %v624_v27  ;;  %v626_v32 = vld [vmem:[%s2488_s4 + $0x10] sm:$0xff] (!%p275_p9)  ;;  %v1639_v33 = vpack.c.bf16 (!%p275_p9), %v1388_v31, %v1387_v30  ;;  %v627_v34 = vld [vmem:[%s2488_s4 + $0x18] sm:$0xff] (!%p275_p9)  ;;  %v1375_v35 = vld [vmem:[%s2487_s3] ss:$0 sm:$0xff] (!%p275_p9)  ;;  %vm614_vm9 = vcmask (!%p275_p9), 97280   ;;  %vm616_vm10 = vcmask (!%p275_p9), 1040992  }
  0x15   : > { %s2031_s12 = scalar_select %p312_p10, %s1955_s9, 1  ;;  %1620 = vmatprep.subr.bf16.mxu0 %v1881_v3  ;;  %1631 = vmatpush3.bf16.msra.mxu1 %v1630_v13  ;;  %v1669_v36 = vpack.c.bf16 %v627_v34, %v626_v32  ;;  %v1389_v38 = vld [vmem:[%s2488_s4 + $0xa0] sm:$0xff]  ;;  %v1390_v39 = vld [vmem:[%s2488_s4 + $0xa8] sm:$0xff]  ;;  %v1391_v50 = vld [vmem:[%s2488_s4 + $0xb0] sm:$0xff]  ;;  %vm618_vm11 = vcmask 90112   ;;  %vm671_vm12 = vcmask 1046528  }
  0x16   : > { %1632 = vmatprep.subr.bf16.mxu1 %v1881_v3  ;;  %v628_v40 = vld [vmem:[%s2488_s4 + $0x20] sm:$0xff]  ;;  %v1642_v44 = vpack.c.bf16 %v1390_v39, %v1389_v38  ;;  %v629_v45 = vld [vmem:[%s2488_s4 + $0x28] sm:$0xff]  ;;  %v1392_v51 = vld [vmem:[%s2488_s4 + $0xb8] sm:$0xff]  ;;  %vm870_vm13 = vcmask 1045504   ;;  %vm329_vm14 = vcmask 588800   ;;  %vm332_vm15 = vcmask 582656  }
  0x17   : > { %s1372_s20 = sshll.u32 %s2031_s12, 3  ;;  %v1672_v47 = vpack.c.bf16 %v629_v45, %v628_v40  ;;  %v630_v52 = vld [vmem:[%s2488_s4 + $0x30] sm:$0xff]  ;;  %v631_v53 = vld [vmem:[%s2488_s4 + $0x38] sm:$0xff]  ;;  %v1645_v54 = vpack.c.bf16 %v1392_v51, %v1391_v50  ;;  %v1393_v57 = vld [vmem:[%s2488_s4 + $0xc0] sm:$0xff]  ;;  %s1460_s25 = sshll.u32 %s2031_s12, 4  ;;  %330 = vst.msk [vmem:[#allocation3] sm:$0xff] %vm329_vm14, %v1882_v8 }
  0x18   : > { %1622 = vmatpush3.bf16.msra.mxu0 %v1621_v18  ;;  %s315_s10 = scalar_lea.vmem %s2484_s0, %s1372_s20  ;;  %v1675_v55 = vpack.c.bf16 %v631_v53, %v630_v52  ;;  %v1394_v58 = vld [vmem:[%s2488_s4 + $0xc8] sm:$0xff]  ;;  %v632_v59 = vld [vmem:[%s2488_s4 + $0x40] sm:$0xff]  ;;  %v1395_v1 = vld [vmem:[%s2488_s4 + $0xd0] sm:$0xff]  ;;  %s320_s24 = scalar_lea.vmem %s2485_s1, %s1460_s25  ;;  %331 = vst.msk [vmem:[#allocation3 + $0x8] sm:$0xff] %vm329_vm14, %v1882_v8  ;;  %vm983_vm0 = vcmask 556064  }
  0x19   : > { %1623 = vmatprep.subr.bf16.mxu0 %v1881_v3  ;;  %1634 = vmatpush3.bf16.msra.mxu1 %v1633_v19  ;;  %v334_v26 = vld [vmem:[%s315_s10] sm:$0xff]  ;;  %v1648_v61 = vpack.c.bf16 %v1394_v58, %v1393_v57  ;;  %v633_v62 = vld [vmem:[%s2488_s4 + $0x48] sm:$0xff]  ;;  %v1396_v2 = vld [vmem:[%s2488_s4 + $0xd8] sm:$0xff]  ;;  %s1885_s10 = smov 76   ;;  %333 = vst.msk [vmem:[#allocation3 + $0x10] sm:$0x3] %vm332_vm15, %v1882_v8 }
  0x1a   : > { %1635 = vmatprep.subr.bf16.mxu1 %v1881_v3  ;;  %v1678_v63 = vpack.c.bf16 %v633_v62, %v632_v59  ;;  %v634_v4 = vld [vmem:[%s2488_s4 + $0x50] sm:$0xff]  ;;  %v1651_v6 = vpack.c.bf16 %v1396_v2, %v1395_v1  ;;  %v635_v7 = vld [vmem:[%s2488_s4 + $0x58] sm:$0xff]  ;;  %v1397_v11 = vld [vmem:[%s2488_s4 + $0xe0] sm:$0xff]  ;;  %s309_s20 = sand.u32 1, %s1871_s28   ;;  %s1886_s25 = smov [#allocation4]  }
  0x1b   : > { %v1681_v9 = vpack.c.bf16 %v635_v7, %v634_v4  ;;  %v1398_v12 = vld [vmem:[%s2488_s4 + $0xe8] sm:$0xff]  ;;  %v636_v13 = vld [vmem:[%s2488_s4 + $0x60] sm:$0xff]  ;;  %v1399_v19 = vld [vmem:[%s2488_s4 + $0xf0] sm:$0xff]  ;;  %s1371_s12 = sshll.u32 %s309_s20, 4 }
  0x1c   : > { %1625 = vmatpush3.bf16.msra.mxu0 %v1624_v24  ;;  %v1654_v15 = vpack.c.bf16 %v1398_v12, %v1397_v11  ;;  %v637_v16 = vld [vmem:[%s2488_s4 + $0x68] sm:$0xff]  ;;  %v1400_v20 = vld [vmem:[%s2488_s4 + $0xf8] sm:$0xff]  ;;  %v638_v21 = vld [vmem:[%s2488_s4 + $0x70] sm:$0xff]  ;;  %s311_s23 = scalar_lea.vmem [#allocation4], %s1371_s12 }
  0x1d   : > { %1637 = vmatpush3.bf16.msra.mxu1 %v1636_v25  ;;  %1638 = vmatprep.subr.bf16.mxu0 %v1881_v3  ;;  %v1684_v17 = vpack.c.bf16 %v637_v16, %v636_v13  ;;  %v1657_v23 = vpack.c.bf16 %v1400_v20, %v1399_v19  ;;  %v639_v24 = vld [vmem:[%s2488_s4 + $0x78] sm:$0xff]  ;;  %v1401_v27 = vld [vmem:[%s2488_s4 + $0x100] sm:$0xff]  ;;  %v1402_v28 = vld [vmem:[%s2488_s4 + $0x108] sm:$0xff] }
  0x1e   : > { %1665 = vmatprep.subr.bf16.mxu1 %v1881_v3  ;;  %v1687_v25 = vpack.c.bf16 %v639_v24, %v638_v21  ;;  %v591_v31 = vld [vmem:[%s320_s24] sm:$0xff]  ;;  %v592_v32 = vld [vmem:[%s320_s24 + $0x8] sm:$0xff]  ;;  %v1403_v39 = vld [vmem:[%s2488_s4 + $0x110] sm:$0xff]  ;;  %s1293_s24 = sshll.u32 %s311_s23, 4  ;;  %s2434_s24 = int_to_ptr.vmem [resolvable:$true] %s1293_s24 }
  0x1f   : > { %1530 = vmatmul.mubr.msk.f32.vlgmr.msra.gmra.mrb[0].mxu0 %vm350_vm1, %v334_v26  ;;  %v641_v34 = vld [vmem:[%s2488_s4 + $0x88] sm:$0xff]  ;;  %v597_v38 = vrot.slane %v592_v32, 7  ;;  %v1404_v40 = vld [vmem:[%s2488_s4 + $0x118] sm:$0xff]  ;;  %s1817_s19 = scalar_lea.vmem %s2434_s24, 256 }
  0x20   : > { %1549 = vmatmul.mubr.msk.f32.vlgmr.msra.gmra.mrb[0].mxu1 %vm350_vm1, %v334_v26  ;;  %1640 = vmatpush1.bf16.msra.mxu0 %v1639_v33  ;;  %v1660_v33 = vpack.c.bf16 %v1402_v28, %v1401_v27  ;;  %v1410_v7 = vld [vmem:[%s2488_s4 + $0x128] sm:$0xff]  ;;  %v1412_v19 = vld [vmem:[%s2488_s4 + $0x138] sm:$0xff]  ;;  %p1818_p11 = scmp.ne.s32.totalorder %s2434_s24, %s1817_s19 }
  0x21   : > { %1667 = vmatpush1.bf16.msra.mxu1 %v1666_v29  ;;  %1641 = vmatprep.subr.bf16.mxu0 %v1881_v3  ;;  %v640_v29 = vld [vmem:[%s2488_s4 + $0x80] sm:$0xff]  ;;  %v1438_v8 = vld [vmem:[%s2490_s6 + $0x88] sm:$0xff] }
  0x22   : > { %1668 = vmatprep.subr.bf16.mxu1 %v1881_v3  ;;  %p1819_p12 = pnand %p1818_p11, %p1972_p5 }
  0x24   : > { %1643 = vmatpush1.bf16.msra.mxu0 %v1642_v44  ;;  %p1820_p13 = pneg %p1819_p12 }
  0x25   : > { %1670 = vmatpush1.bf16.msra.mxu1 %v1669_v36  ;;  %1644 = vmatprep.subr.bf16.mxu0 %v1881_v3 }
  0x26   : > { %1671 = vmatprep.subr.bf16.mxu1 %v1881_v3 }
  0x28   : > { %1646 = vmatpush1.bf16.msra.mxu0 %v1645_v54 }
  0x29   : > { %1673 = vmatpush1.bf16.msra.mxu1 %v1672_v47  ;;  %1647 = vmatprep.subr.bf16.mxu0 %v1881_v3 }
  0x2a   : > { %1674 = vmatprep.subr.bf16.mxu1 %v1881_v3 }
  0x2c   : > { %1649 = vmatpush1.bf16.msra.mxu0 %v1648_v61 }
  0x2d   : > { %1676 = vmatpush1.bf16.msra.mxu1 %v1675_v55  ;;  %1650 = vmatprep.subr.bf16.mxu0 %v1881_v3 }
  0x2e   : > { %1677 = vmatprep.subr.bf16.mxu1 %v1881_v3 }
  0x30   : > { %1652 = vmatpush1.bf16.msra.mxu0 %v1651_v6  ;;  %v1409_v6 = vld [vmem:[%s2488_s4 + $0x120] sm:$0xff] }
  0x31   : > { %1679 = vmatpush1.bf16.msra.mxu1 %v1678_v63  ;;  %1653 = vmatprep.subr.bf16.mxu0 %v1881_v3 }
  0x32   : > { %1680 = vmatprep.subr.bf16.mxu1 %v1881_v3 }
  0x34   : > { %1655 = vmatpush1.bf16.msra.mxu0 %v1654_v15 }
  0x35   : > { %1682 = vmatpush1.bf16.msra.mxu1 %v1681_v9  ;;  %1656 = vmatprep.subr.bf16.mxu0 %v1881_v3 }
  0x36   : > { %1683 = vmatprep.subr.bf16.mxu1 %v1881_v3 }
  0x38   : > { %1658 = vmatpush1.bf16.msra.mxu0 %v1657_v23 }
  0x39   : > { %1685 = vmatpush1.bf16.msra.mxu1 %v1684_v17  ;;  %1659 = vmatprep.subr.bf16.mxu0 %v1881_v3 }
  0x3a   : > { %1686 = vmatprep.subr.bf16.mxu1 %v1881_v3 }
  0x3c   : > { %1661 = vmatpush1.bf16.msra.mxu0 %v1660_v33  ;;  %v1415_v33 = vld [vmem:[%s2488_s4 + $0x150] sm:$0xff] }
  0x3d   : > { %1688 = vmatpush1.bf16.msra.mxu1 %v1687_v25  ;;  %1662 = vmatprep.subr.bf16.mxu0 %v1881_v3 }
  0x3e   : > { %1689 = vmatprep.subr.bf16.mxu1 %v1881_v3 }
  0xf2   : > { %v420_v37 = vpop.f32.mrb[0].mxu0 }
  0xf3   : > { %v2089_v41 = vadd.f32 %v1375_v35, %v420_v37  ;;  %v1531_v42 = vpop.f32.mrb[1].mxu0  ;;  %v547_v43 = vpop.f32.mrb[0].mxu1  ;;  %v596_v37 = vrot.slane %v591_v31, 7 }
  0xf4   : > { %v1550_v46 = vpop.f32.mrb[1].mxu1  ;;  %v2095_v48 = vadd.f32 %v1375_v35, %v547_v43  ;;  %v1690_v35 = vpack.c.bf16 %v641_v34, %v640_v29  ;;  %v1663_v42 = vpack.c.bf16 %v1404_v40, %v1403_v39  ;;  %v1413_v29 = vld [vmem:[%s2488_s4 + $0x140] sm:$0xff]  ;;  %v1416_v34 = vld [vmem:[%s2488_s4 + $0x158] sm:$0xff]  ;;  %v1419_v39 = vld [vmem:[%s2488_s4 + $0x170] sm:$0xff] }
  0xf5   : > { %425 = vrot.lane.b32.xlu0 %v2089_v41, %s1884_s26  ;;  %v435_v49 = vrot.slane %v2089_v41, 2  ;;  %v440_v56 = vrot.slane %v2089_v41, 3  ;;  %v430_v60 = vrot.slane %v2089_v41, 1  ;;  %v450_v0 = vrot.slane %v2089_v41, 5  ;;  %v1420_v40 = vld [vmem:[%s2488_s4 + $0x178] sm:$0xff] }
  0xf6   : > { %v445_v5 = vrot.slane %v2089_v41, 4  ;;  %v460_v10 = vrot.slane %v2089_v41, 7  ;;  %v455_v14 = vrot.slane %v2089_v41, 6  ;;  %v556_v18 = vrot.slane %v2095_v48, 1  ;;  %1691 = vmatpush1.bf16.msra.mxu1 %v1690_v35  ;;  %1664 = vmatpush1.bf16.msra.mxu0 %v1663_v42  ;;  %v1421_v42 = vld [vmem:[%s2488_s4 + $0x180] sm:$0xff] }
  0xf7   : > { %436 = vrot.lane.b32.xlu1 %v435_v49, %s1884_s26  ;;  %v561_v22 = vrot.slane %v2095_v48, 2  ;;  %v566_v26 = vrot.slane %v2095_v48, 3  ;;  %v571_v30 = vrot.slane %v2095_v48, 4  ;;  %v576_v36 = vrot.slane %v2095_v48, 5  ;;  %1692 = vmatprep.subr.bf16.mxu0 %v1881_v3 }
  0xf8   : > { %v581_v41 = vrot.slane %v2095_v48, 6  ;;  %v598_v43 = vsel %vm595_vm4, %v596_v37, %v597_v38  ;;  %v586_v44 = vrot.slane %v2095_v48, 7  ;;  %v1702_v35 = vpack.c.bf16 %v1416_v34, %v1415_v33 }
  0xf9   : > { %552 = vrot.lane.b32.xlu0 %v2095_v48, %s1884_s26 }
  0xfb   : > { %441 = vrot.lane.b32.xlu1 %v440_v56, %s1884_s26 }
  0xfd   : > { %431 = vrot.lane.b32.xlu0 %v430_v60, %s1884_s26 }
  0xff   : > { %451 = vrot.lane.b32.xlu1 %v450_v0, %s1884_s26 }
 0x101   : > { %446 = vrot.lane.b32.xlu0 %v445_v5, %s1884_s26 }
 0x103   : > { %461 = vrot.lane.b32.xlu1 %v460_v10, %s1884_s26 }
 0x105   : > { %456 = vrot.lane.b32.xlu0 %v455_v14, %s1884_s26  ;;  %v1693_v14 = vpack.c.bf16 %v1410_v7, %v1409_v6 }
 0x107   : > { %557 = vrot.lane.b32.xlu1 %v556_v18, %s1884_s26  ;;  %v1411_v18 = vld [vmem:[%s2488_s4 + $0x130] sm:$0xff] }
 0x109   : > { %562 = vrot.lane.b32.xlu0 %v561_v22, %s1884_s26 }
 0x10b   : > { %567 = vrot.lane.b32.xlu1 %v566_v26, %s1884_s26  ;;  %v1696_v26 = vpack.c.bf16 %v1412_v19, %v1411_v18  ;;  %v1437_v18 = vld [vmem:[%s2490_s6 + $0x80] sm:$0xff] }
 0x10d   : > { %572 = vrot.lane.b32.xlu0 %v571_v30, %s1884_s26  ;;  %v1414_v30 = vld [vmem:[%s2488_s4 + $0x148] sm:$0xff] }
 0x10e   : > { %v1699_v32 = vpack.c.bf16 %v1414_v30, %v1413_v29 }
 0x10f   : > { %577 = vrot.lane.b32.xlu1 %v576_v36, %s1884_s26  ;;  %v1417_v36 = vld [vmem:[%s2488_s4 + $0x160] sm:$0xff] }
 0x111   : > { %582 = vrot.lane.b32.xlu0 %v581_v41, %s1884_s26  ;;  %v1708_v41 = vpack.c.bf16 %v1420_v40, %v1419_v39 }
 0x113   : > { %599 = vrot.lane.b32.xlu1 %v596_v37, %s1885_s10  ;;  %v1418_v37 = vld [vmem:[%s2488_s4 + $0x168] sm:$0xff] }
 0x115   : > { %601 = vrot.lane.b32.xlu0 %v598_v43, %s1885_s10  ;;  %v1422_v43 = vld [vmem:[%s2488_s4 + $0x188] sm:$0xff] }
 0x117   : > { %587 = vrot.lane.b32.xlu1 %v586_v44, %s1884_s26  ;;  %v1711_v44 = vpack.c.bf16 %v1422_v43, %v1421_v42  ;;  %v993_v42 = vld [vmem:[%s2490_s6 + $0x28] sm:$0xff] }
 0x119   : > { %603 = vrot.lane.b32.xlu0 %v597_v38, %s1885_s10  ;;  %v1705_v38 = vpack.c.bf16 %v1418_v37, %v1417_v36  ;;  %v990_v37 = vld [vmem:[%s2490_s6 + $0x10] sm:$0xff]  ;;  %s1461_s10 = sshll.u32 %s1955_s9, 8  ;;  %s2443_s9 = scalar_lea.sflag [#allocation5], %s309_s20 }
 0x11a   : > { %s2439_s18 = scalar_lea.hbm %s2492_s8, %s1461_s10 }
 0x167   : > { %v426_v45 = vpop.permute.xlu0 %425 }
 0x168   : > { %429 = vst.msk [vmem:[#allocation2 + $0x1] sm:$0x1] %vm428_vm5, %v426_v45  ;;  %v1423_v45 = vld [vmem:[%s2488_s4 + $0x190] sm:$0xff] }
 0x169   : > { %v437_v46 = vpop.permute.xlu1 %436 }
 0x16a   : > { %439 = vst.msk [vmem:[#allocation2 + $0x5] sm:$0x1] %vm428_vm5, %v437_v46  ;;  %v1424_v46 = vld [vmem:[%s2488_s4 + $0x198] sm:$0xff] }
 0x16b   : > { %v553_v47 = vpop.permute.xlu0 %552 }
 0x16c   : > { %555 = vst.msk [vmem:[#allocation2 + $0x2] sm:$0x1] %vm428_vm5, %v553_v47  ;;  %v1714_v47 = vpack.c.bf16 %v1424_v46, %v1423_v45  ;;  %v994_v45 = vld [vmem:[%s2490_s6 + $0x30] sm:$0xff]  ;;  %v995_v46 = vld [vmem:[%s2490_s6 + $0x38] sm:$0xff] }
 0x16d   : > { %v442_v49 = vpop.permute.xlu1 %441 }
 0x16e   : > { %444 = vst.msk [vmem:[#allocation2 + $0x7] sm:$0x1] %vm428_vm5, %v442_v49  ;;  %v1425_v49 = vld [vmem:[%s2488_s4 + $0x1a0] sm:$0xff] }
 0x16f   : > { %v432_v50 = vpop.permute.xlu0 %431 }
 0x170   : > { %434 = vst.msk [vmem:[#allocation2 + $0x3] sm:$0x1] %vm428_vm5, %v432_v50  ;;  %v1426_v50 = vld [vmem:[%s2488_s4 + $0x1a8] sm:$0xff] }
 0x171   : > { %v452_v48 = vpop.permute.xlu1 %451 }
 0x172   : > { %454 = vst.msk [vmem:[#allocation2 + $0x13] sm:$0x1] %vm428_vm5, %v452_v48 }
 0x173   : > { %v447_v51 = vpop.permute.xlu0 %446 }
 0x174   : > { %449 = vst.msk [vmem:[#allocation2 + $0x11] sm:$0x1] %vm428_vm5, %v447_v51  ;;  %v1717_v51 = vpack.c.bf16 %v1426_v50, %v1425_v49  ;;  %v996_v49 = vld [vmem:[%s2490_s6 + $0x40] sm:$0xff]  ;;  %v1443_v50 = vld [vmem:[%s2490_s6 + $0x90] sm:$0xff] }
 0x175   : > { %v462_v52 = vpop.permute.xlu1 %461 }
 0x176   : > { %464 = vst.msk [vmem:[#allocation2 + $0x17] sm:$0x1] %vm428_vm5, %v462_v52 }
 0x177   : > { %v457_v53 = vpop.permute.xlu0 %456 }
 0x178   : > { %459 = vst.msk [vmem:[#allocation2 + $0x15] sm:$0x1] %vm428_vm5, %v457_v53 }
 0x179   : > { %v558_v54 = vpop.permute.xlu1 %557 }
 0x17a   : > { %560 = vst.msk [vmem:[#allocation2 + $0x4] sm:$0x1] %vm428_vm5, %v558_v54 }
 0x17b   : > { %v563_v55 = vpop.permute.xlu0 %562 }
 0x17c   : > { %565 = vst.msk [vmem:[#allocation2 + $0x6] sm:$0x1] %vm428_vm5, %v563_v55 }
 0x17d   : > { %v568_v56 = vpop.permute.xlu1 %567 }
 0x17e   : > { %570 = vst.msk [vmem:[#allocation2 + $0x10] sm:$0x1] %vm428_vm5, %v568_v56 }
 0x17f   : > { %v573_v57 = vpop.permute.xlu0 %572 }
 0x180   : > { %575 = vst.msk [vmem:[#allocation2 + $0x12] sm:$0x1] %vm428_vm5, %v573_v57 }
 0x181   : > { %v578_v58 = vpop.permute.xlu1 %577 }
 0x182   : > { %580 = vst.msk [vmem:[#allocation2 + $0x14] sm:$0x1] %vm428_vm5, %v578_v58 }
 0x183   : > { %v583_v59 = vpop.permute.xlu0 %582 }
 0x184   : > { %585 = vst.msk [vmem:[#allocation2 + $0x16] sm:$0x1] %vm428_vm5, %v583_v59 }
 0x185   : > { %v600_v60 = vpop.permute.xlu1 %599 }
 0x186   : > { %609 = vst.msk [vmem:[#allocation2] sm:$0xfe] %vm608_vm6, %v600_v60 }
 0x187   : > { %611 = vst.msk [vmem:[#allocation2 + $0x8] sm:$0xfe] %vm610_vm7, %v600_v60  ;;  %v602_v61 = vpop.permute.xlu0 %601 }
 0x188   : > { %613 = vst.msk [vmem:[#allocation2 + $0x10] sm:$0xff] %vm612_vm8, %v602_v61 }
 0x189   : > { %615 = vst.msk [vmem:[#allocation2 + $0x18] sm:$0xff] %vm614_vm9, %v602_v61  ;;  %v588_v62 = vpop.permute.xlu1 %587  ;;  %v1431_v61 = vld [vmem:[%s2490_s6 + $0x50] sm:$0xff] }
 0x18a   : > { %590 = vst.msk [vmem:[#allocation2 + $0x20] sm:$0x1] %vm428_vm5, %v588_v62  ;;  %v1432_v62 = vld [vmem:[%s2490_s6 + $0x58] sm:$0xff] }
 0x18b   : > { %v604_v63 = vpop.permute.xlu0 %603 }
 0x18c   : > { %617 = vst.msk [vmem:[#allocation2 + $0x20] sm:$0x1] %vm616_vm10, %v604_v63 }
 0x18d   : > { %619 = vst.msk [vmem:[#allocation2 + $0x28] sm:$0x1] %vm618_vm11, %v604_v63  ;;  %v620_v1 = vld [vmem:[#allocation2] sm:$0xff] }
 0x18e   : > { %v621_v0 = vld [vmem:[#allocation2 + $0x8] sm:$0xff]  ;;  %v642_v5 = vld [vmem:[#allocation2] sm:$0xfe] }
 0x18f   : > { %v643_v2 = vld [vmem:[#allocation2 + $0x8] sm:$0xfe]  ;;  %1407 = vmatprep.mubr.msk.f32.mxu1 %vm322_vm2, %v621_v0  ;;  %v2255_v10 = vld [vmem:[#allocation2 + $0x10] sm:$0xff]  ;;  %v672_v11 = vrot.slane %v642_v5, 1  ;;  %v843_v48 = vld [vmem:[#allocation2] sm:$0xfc] }
 0x190   : > { %v675_v4 = vrot.slane %v643_v2, 1  ;;  %833 = vmatmul.mubr.f32.vlgmr.msra.gmra.mrb[2].mxu1 %v620_v1  ;;  %v2253_v9 = vld [vmem:[#allocation2 + $0x18] sm:$0xff]  ;;  %v673_v13 = vrot.slane %v2255_v10, 1  ;;  %v844_v15 = vld [vmem:[#allocation2 + $0x8] sm:$0xfc]  ;;  %v872_v53 = vrot.slane %v2255_v10, 2 }
 0x191   : > { %v676_v12 = vrot.slane %v2253_v9, 1  ;;  %1408 = vmatprep.mubr.msk.f32.mxu1 %vm322_vm2, %v2253_v9  ;;  %v875_v22 = vrot.slane %v2253_v9, 2  ;;  %v874_v25 = vrot.slane %v844_v15, 2  ;;  %v871_v54 = vrot.slane %v843_v48, 2  ;;  %v1433_v0 = vld [vmem:[%s2490_s6 + $0x60] sm:$0xff]  ;;  %v1435_v15 = vld [vmem:[%s2490_s6 + $0x70] sm:$0xff] }
 0x192   : > { %v674_v17 = vsel %vm671_vm12, %v672_v11, %v673_v13  ;;  %v1723_v1 = vpack.c.bf16 %v1433_v0, %v1432_v62  ;;  %v1444_v48 = vld [vmem:[%s2490_s6 + $0x98] sm:$0xff]  ;;  %v1451_v62 = vld [vmem:[%s2490_s6 + $0xd0] sm:$0xff]  ;;  %v1454_v0 = vld [vmem:[%s2491_s7] ss:$0 sm:$0xff] }
 0x193   : > { %v677_v16 = vsel %vm671_vm12, %v675_v4, %v676_v12  ;;  %v644_v21 = vld [vmem:[#allocation2 + $0x20] sm:$0x1]  ;;  %v876_v31 = vsel %vm870_vm13, %v874_v25, %v875_v22  ;;  %v873_v57 = vsel %vm870_vm13, %v871_v54, %v872_v53  ;;  %v989_v25 = vld [vmem:[%s2490_s6 + $0x8] sm:$0xff] }
 0x194   : > { %1405 = vmatprep.mubr.msk.f32.mxu0 %vm322_vm2, %v677_v16  ;;  %838 = vmatmul.mubr.f32.gmra.mrb[4].mxu1 %v2255_v10  ;;  %v645_v20 = vld [vmem:[#allocation2 + $0x28] sm:$0x1]  ;;  %v678_v24 = vrot.slane %v644_v21, 1  ;;  %v845_v56 = vld [vmem:[#allocation2 + $0x20] sm:$0x3] }
 0x195   : > { %753 = vmatmul.mubr.f32.vlgmr.msra.gmra.mrb[2].mxu0 %v674_v17  ;;  %v680_v23 = vrot.slane %v645_v20, 1  ;;  %v846_v52 = vld [vmem:[#allocation2 + $0x28] sm:$0x3]  ;;  %v877_v58 = vrot.slane %v845_v56, 2  ;;  %v1436_v17 = vld [vmem:[%s2490_s6 + $0x78] sm:$0xff]  ;;  %v1447_v56 = vld [vmem:[%s2490_s6 + $0xb0] sm:$0xff] }
 0x196   : > { %1694 = vmatpush1.bf16.msra.mxu0 %v1693_v14  ;;  %v679_v28 = vsel %vm671_vm12, %v673_v13, %v678_v24  ;;  %v879_v55 = vrot.slane %v846_v52, 2  ;;  %v1434_v14 = vld [vmem:[%s2490_s6 + $0x68] sm:$0xff]  ;;  %v1731_v19 = vpack.c.bf16 %v1437_v18, %v1436_v17  ;;  %v1429_v21 = vld [vmem:[%s2489_s5] ss:$0 sm:$0xff] }
 0x197   : > { %v681_v27 = vsel %vm671_vm12, %v676_v12, %v680_v23  ;;  %1695 = vmatprep.subr.bf16.mxu0 %v1881_v3  ;;  %v878_v60 = vsel %vm870_vm13, %v872_v53, %v877_v58  ;;  %v1727_v16 = vpack.c.bf16 %v1435_v15, %v1434_v14  ;;  %v988_v24 = vld [vmem:[%s2490_s6] sm:$0xff]  ;;  %v1446_v52 = vld [vmem:[%s2490_s6 + $0xa8] sm:$0xff]  ;;  %v1751_v53 = vpack.c.bf16 %v1444_v48, %v1443_v50 }
 0x198   : > { %1406 = vmatprep.mubr.msk.f32.mxu0 %vm322_vm2, %v681_v27  ;;  %v880_v59 = vsel %vm870_vm13, %v875_v22, %v879_v55  ;;  %v1735_v27 = vpack.c.bf16 %v989_v25, %v988_v24 }
 0x199   : > { %758 = vmatmul.mubr.f32.gmra.mrb[4].mxu0 %v679_v28 }
 0x19a   : > { %1697 = vmatpush1.bf16.msra.mxu0 %v1696_v26  ;;  %1427 = vmatprep.mubr.msk.f32.mxu0 %vm322_vm2, %v876_v31 }
 0x19b   : > { %1698 = vmatprep.subr.bf16.mxu0 %v1881_v3 }
 0x19e   : > { %1700 = vmatpush1.bf16.msra.mxu0 %v1699_v32 }
 0x19f   : > { %1701 = vmatprep.subr.bf16.mxu0 %v1881_v3 }
 0x1a2   : > { %1703 = vmatpush1.bf16.msra.mxu0 %v1702_v35 }
 0x1a3   : > { %1704 = vmatprep.subr.bf16.mxu0 %v1881_v3 }
 0x1a6   : > { %1706 = vmatpush1.bf16.msra.mxu0 %v1705_v38  ;;  %v991_v38 = vld [vmem:[%s2490_s6 + $0x18] sm:$0xff] }
 0x1a7   : > { %1707 = vmatprep.subr.bf16.mxu0 %v1881_v3  ;;  %v1739_v39 = vpack.c.bf16 %v991_v38, %v990_v37 }
 0x1aa   : > { %1709 = vmatpush1.bf16.msra.mxu0 %v1708_v41  ;;  %v992_v41 = vld [vmem:[%s2490_s6 + $0x20] sm:$0xff] }
 0x1ab   : > { %1710 = vmatprep.subr.bf16.mxu0 %v1881_v3 }
 0x1ae   : > { %1712 = vmatpush1.bf16.msra.mxu0 %v1711_v44  ;;  %v1743_v44 = vpack.c.bf16 %v993_v42, %v992_v41 }
 0x1af   : > { %1713 = vmatprep.subr.bf16.mxu0 %v1881_v3 }
 0x1b2   : > { %1715 = vmatpush1.bf16.msra.mxu0 %v1714_v47  ;;  %v1747_v47 = vpack.c.bf16 %v995_v46, %v994_v45 }
 0x1b3   : > { %1716 = vmatprep.subr.bf16.mxu0 %v1881_v3  ;;  %v1430_v3 = vld [vmem:[%s2490_s6 + $0x48] sm:$0xff] }
 0x1b4   : > { %v1719_v63 = vpack.c.bf16 %v1431_v61, %v1430_v3  ;;  %v1450_v3 = vld [vmem:[%s2490_s6 + $0xc8] sm:$0xff] }
 0x1b6   : > { %1718 = vmatpush1.bf16.msra.mxu0 %v1717_v51  ;;  %1720 = vmatprep.subr.bf16.mxu1 %v1719_v63  ;;  %v1445_v51 = vld [vmem:[%s2490_s6 + $0xa0] sm:$0xff] }
 0x1b7   : > { %1722 = vmatpush3.bf16.msra.mxu1 %v1719_v63  ;;  %v1755_v54 = vpack.c.bf16 %v1446_v52, %v1445_v51 }
 0x1b8   : > { %1724 = vmatprep.subr.bf16.mxu1 %v1723_v1 }
 0x1b9   : > { %952 = vmatmul.mubr.f32.vlgmr.msra.gmra.mrb[6].mxu0 %v873_v57  ;;  %v1448_v57 = vld [vmem:[%s2490_s6 + $0xb8] sm:$0xff] }
 0x1ba   : > { %1428 = vmatprep.mubr.msk.f32.mxu0 %vm322_vm2, %v880_v59  ;;  %v1759_v59 = vpack.c.bf16 %v1448_v57, %v1447_v56 }
 0x1bb   : > { %1726 = vmatpush3.bf16.msra.mxu1 %v1723_v1 }
 0x1bc   : > { %1728 = vmatprep.subr.bf16.mxu1 %v1727_v16 }
 0x1bd   : > { %957 = vmatmul.mubr.f32.gmra.mrb[8].mxu0 %v878_v60  ;;  %v1449_v60 = vld [vmem:[%s2490_s6 + $0xc0] sm:$0xff] }
 0x1be   : > { %v1763_v61 = vpack.c.bf16 %v1450_v3, %v1449_v60 }
 0x1bf   : > { %1730 = vmatpush3.bf16.msra.mxu1 %v1727_v16 }
 0x1c0   : > { %1732 = vmatprep.subr.bf16.mxu1 %v1731_v19 }
 0x1c3   : > { %1734 = vmatpush3.bf16.msra.mxu1 %v1731_v19 }
 0x1c4   : > { %1567 = vmatprep.subr.mxu1 %v1438_v8 }
 0x1c7   : > { %1568 = vmatpush3.msra.mxu1 %v1438_v8 }
 0x1c8   : > { %1736 = vmatprep.subr.bf16.mxu1 %v1735_v27 }
 0x263   : > { %v834_v2 = vpop.f32.mrb[2].mxu1 }
 0x264   : > { %v836_v4 = vpop.f32.mrb[3].mxu1 }
 0x267   : > { %v839_v5 = vpop.f32.mrb[4].mxu1 }
 0x268   : > { %v754_v6 = vpop.f32.mrb[2].mxu0  ;;  %v841_v7 = vpop.f32.mrb[5].mxu1 }
 0x269   : > { %v835_v9 = vadd.f32 %v834_v2, %v754_v6  ;;  %v756_v10 = vpop.f32.mrb[3].mxu0 }
 0x26c   : > { %v759_v11 = vpop.f32.mrb[4].mxu0 }
 0x26d   : > { %v840_v12 = vadd.f32 %v839_v5, %v759_v11  ;;  %v761_v13 = vpop.f32.mrb[5].mxu0 }
 0x28c   : > { %v953_v20 = vpop.f32.mrb[6].mxu0 }
 0x28d   : > { %v962_v22 = vadd.f32 %v953_v20, %v835_v9  ;;  %v955_v23 = vpop.f32.mrb[7].mxu0 }
 0x28f   : > { %v971_v26 = vadd.f32 %v1429_v21, %v962_v22 }
 0x290   : > { %v958_v28 = vpop.f32.mrb[8].mxu0 }
 0x291   : > { %v973_v29 = vmax.f32 %v971_v26, 0.0  ;;  %v963_v30 = vadd.f32 %v958_v28, %v840_v12  ;;  %v960_v31 = vpop.f32.mrb[9].mxu0 }
 0x293   : > { %v972_v32 = vadd.f32 %v1429_v21, %v963_v30  ;;  %977 = vrot.lane.b32.xlu1 %v973_v29, %s1884_s26 }
 0x295   : > { %v974_v33 = vmax.f32 %v972_v32, 0.0 }
 0x297   : > { %979 = vrot.lane.b32.xlu0 %v974_v33, %s1884_s26  ;;  %s1821_s26 = sshll.u32 %s1886_s25, 4  ;;  %s1822_s26 = int_to_ptr.vmem [resolvable:$false] %s1821_s26 }
 0x298   : > { %s1823_s12 = scalar_lea.vmem %s1822_s26, 512  ;;  %p1824_p0 = scmp.lt.s32.totalorder %s2434_s24, %s1822_s26 }
 0x299   : > { %p1825_p1 = scmp.lt.s32.totalorder %s1823_s12, %s1817_s19 }
 0x29b   : > { %p1826_p2 = por %p1825_p1, %p1824_p0 }
 0x29d   : > { %p1827_p3 = pnand %p1826_p2, %p1820_p13 }
 0x305   : > { %v978_v34 = vpop.permute.xlu1 %977 }
 0x306   : > { %984 = vst.msk [vmem:[#allocation3 + $0x1] sm:$0xff] %vm983_vm0, %v978_v34 }
 0x309   : > { %v980_v35 = vpop.permute.xlu0 %979 }
 0x30a   : > { %985 = vst.msk [vmem:[#allocation3 + $0x9] sm:$0xff] %vm983_vm0, %v980_v35 }
 0x30d   : > { %v997_v36 = vld [vmem:[#allocation3 + $0x1] sm:$0xff] }
 0x30e   : > { %1569 = vmatprep.mubr.msk.f32.mxu1 %vm329_vm14, %v997_v36  ;;  %v986_v43 = vld [vmem:[#allocation3] sm:$0xff] }
 0x311   : > { %v998_v40 = vld [vmem:[#allocation3 + $0x9] sm:$0xff] }
 0x312   : > { %1570 = vmatmul.mubr.msk.f32.vlgmr.msra.gmra.mrb[6].mxu1 %vm329_vm14, %v998_v40  ;;  %v987_v55 = vld [vmem:[#allocation3 + $0x8] sm:$0xff] }
 0x313   : > { %1738 = vmatpush3.bf16.msra.mxu1 %v1735_v27  ;;  %1590 = vmatprep.mubr.msk.f32.mxu1 %vm329_vm14, %v986_v43  ;;  %v1171_v58 = vld [vmem:[#allocation3 + $0x2] sm:$0xff]  ;;  %v1172_v63 = vld [vmem:[#allocation3 + $0xa] sm:$0xff] }
 0x314   : > { %1740 = vmatprep.subr.bf16.mxu1 %v1739_v39 }
 0x317   : > { %1742 = vmatpush3.bf16.msra.mxu1 %v1739_v39 }
 0x318   : > { %1744 = vmatprep.subr.bf16.mxu1 %v1743_v44 }
 0x31b   : > { %1746 = vmatpush3.bf16.msra.mxu1 %v1743_v44 }
 0x31c   : > { %1748 = vmatprep.subr.bf16.mxu1 %v1747_v47 }
 0x31f   : > { %1750 = vmatpush3.bf16.msra.mxu1 %v1747_v47 }
 0x320   : > { %1588 = vmatprep.subr.mxu1 %v996_v49 }
 0x323   : > { %1589 = vmatpush3.msra.mxu1 %v996_v49 }
 0x324   : > { %1591 = vmatmul.mubr.msk.f32.vlgmr.msra.gmra.mrb[6].mxu1 %vm329_vm14, %v987_v55  ;;  %1752 = vmatprep.subr.bf16.mxu1 %v1751_v53 }
 0x325   : > { %1754 = vmatpush3.bf16.msra.mxu1 %v1751_v53  ;;  %1611 = vmatprep.mubr.msk.f32.mxu1 %vm329_vm14, %v1171_v58 }
 0x326   : > { %1756 = vmatprep.subr.bf16.mxu1 %v1755_v54 }
 0x329   : > { %1758 = vmatpush3.bf16.msra.mxu1 %v1755_v54 }
 0x32a   : > { %1760 = vmatprep.subr.bf16.mxu1 %v1759_v59 }
 0x32d   : > { %1762 = vmatpush3.bf16.msra.mxu1 %v1759_v59 }
 0x32e   : > { %1764 = vmatprep.subr.bf16.mxu1 %v1763_v61 }
 0x331   : > { %1766 = vmatpush3.bf16.msra.mxu1 %v1763_v61 }
 0x332   : > { %1609 = vmatprep.subr.mxu1 %v1451_v62 }
 0x335   : > { %1610 = vmatpush3.msra.mxu1 %v1451_v62 }
 0x336   : > { %1612 = vmatmul.mubr.msk.f32.vlgmr.msra.gmra.mrb[6].mxu1 %vm329_vm14, %v1172_v63 }
 0x409   : > { %v1613_v1 = vpop.f32.mrb[6].mxu1 }
 0x40a   : > { %v1274_v2 = vadd.f32 %v1613_v1, %v1454_v0  ;;  %v1255_v4 = vpop.f32.mrb[7].mxu1 }
 0x40b   : > { %v1273_v5 = vadd.f32 %v1454_v0, %v1255_v4 }
 0x40c   : > { %v1276_v6 = vmax.f32 %v1274_v2, 0.0 }
 0x40d   : > { %v1275_v7 = vmax.f32 %v1273_v5, 0.0 }
 0x40e   : > { %1278 = vst.msk [vmem:[%s311_s23 + $0x8] sm:$0xff] %vm350_vm1, %v1276_v6 }
 0x40f   : > { %1277 = vst.msk [vmem:[%s311_s23] sm:$0xff] %vm350_vm1, %v1275_v7 }
 0x410   : > { %1830 = shalt.err (!%p1827_p3)
}
 0x411   : > { %s1831_s20 = scalar_lea.hbm %s2439_s18, 256  ;;  %s1835_s23 = scalar_lea.hbm %s2492_s8, 512 }
 0x412   : > { %p1832_p4 = scmp.ne.s32.totalorder %s2439_s18, %s1831_s20  ;;  %p1836_p9 = scmp.lt.u32.totalorder %s2439_s18, %s2492_s8 }
 0x413   : > { %p1837_p10 = scmp.lt.u32.totalorder %s1835_s23, %s1831_s20  ;;  %p1839_p12 = scmp.lt.u32.totalorder %s1831_s20, %s2439_s18 }
 0x414   : > { %p1833_p7 = pnand %p1832_p4, %p1972_p5 }
 0x415   : > { %p1838_p11 = por %p1837_p10, %p1836_p9 }
 0x416   : > { %p1834_p8 = pneg %p1833_p7 }
 0x417   : > { %p1840_p13 = por %p1839_p12, %p1838_p11 }
 0x419   : > { %p1841_p0 = pnand %p1840_p13, %p1834_p8 }
 0x41b   : > { %1844 = shalt.err (!%p1841_p0)
}
 0x41c   : > { %s1887_s17 = smov 128   ;;  %s1888_s19 = smov 8  }
 0x41d   : > { %1771 = dma.vmem_to_hbm [thread:$0]  (%p1972_p5), %s2434_s24, 256, %s2439_s18, %s2443_s9, %s1887_s17, %s1887_s17, %s1888_s19  }
 0x41e PF: > { %p1777_p1 = scmp.ge.s32.totalorder %s1879_s30, 2  ;;  %s1308_s25 = sand.u32 1, %s1867_s27  }
 0x41f   : > { %s1309_s26 = scalar_lea.sflag [#allocation5], %s1308_s25 }
 0x420   : > { %p1774_p2 = pnand %p1777_p1, %p1976_p6 }
 0x422   : > { %1862 = dma.done.wait (!%p1774_p2), %s1309_s26, 256  }
 0x423   : > { %1864 = vsyncadd (!%p1774_p2), %s1309_s26, 4294967040  ;;  %p18_p3 = scmp.ge.s32.totalorder %s1959_s11, 4   ;;  %s2495_s27 = smov %s1871_s28 }
 0x424   : > { %s2496_s28 = smov %s1875_s29  ;;  %s2497_s29 = smov %s1970_s14 }
 0x425   : > { %s2498_s30 = smov %s1959_s11  ;;  %20 = sbr.rel (!%p18_p3) target bundleno = 3 (0x3), region = 95 }
 0x42c   :  { %1314 = vsyncpa [#allocation5], 1 }
 0x42d   :  { %1316 = vsyncpa [#allocation5 + $0x1], 1 }

</bundles_post_ra>
